<compile_context>
chip_gen: v6e
topology: v6e:2x2x1
jax: 0.10.0
libtpu: 0.0.40
codegen_flags: <defaults>
</compile_context>

<pallas_src>
import jax
import jax.numpy as jnp
from jax.experimental import pallas as pl
from jax.experimental.pallas import tpu as pltpu

EPS = 1e-9          # matches the module's default eps (passed to BatchNorm1d)
LANE = 128


# ---------------------------------------------------------------------------
# Single-pass kernel: full batch resident, feature axis tiled.
# ---------------------------------------------------------------------------
def dice_kernel(x_ref, alpha_ref, o_ref):
    # x_ref: [B, td] (full batch, feature slice); alpha_ref: [1, td] f32.
    x = x_ref[...].astype(jnp.float32)
    inv_n = 1.0 / x.shape[0]

    # Exact two-pass batch statistics (biased variance, BN training mode).
    mean = jnp.sum(x, axis=0, keepdims=True) * inv_n            # [1, td]
    d = x - mean                                                # reused below
    var = jnp.sum(d * d, axis=0, keepdims=True) * inv_n         # [1, td]

    p = jax.nn.sigmoid(d * jax.lax.rsqrt(var + EPS))            # EUP transcendental

    alpha = alpha_ref[...]                                      # [1, td] f32
    # out = p*x + (1-p)*alpha*x == x * (alpha + p*(1-alpha))
    o_ref[...] = (x * (alpha + p * (1.0 - alpha))).astype(o_ref.dtype)


# ---------------------------------------------------------------------------
# Two-pass fallback kernel for very large B: batch axis tiled, stats in scratch.
# Grid = (n_d_tiles, 2 * n_b_tiles); k < nb accumulates, k >= nb normalizes.
# ---------------------------------------------------------------------------
def _make_two_pass_kernel(b_total: int, tb: int, nb: int):
    inv_n = 1.0 / b_total

    def kernel(x_ref, alpha_ref, o_ref, shift_ref, sum_ref, sumsq_ref):
        k = pl.program_id(1)
        b = k % nb

        @pl.when(k == 0)
        def _():
            # Shifted one-pass accumulation: subtract the first row to avoid
            # catastrophic cancellation in E[x^2] - E[x]^2.
            shift_ref[...] = x_ref[0:1, :].astype(jnp.float32)
            sum_ref[...] = jnp.zeros_like(sum_ref)
            sumsq_ref[...] = jnp.zeros_like(sumsq_ref)

        @pl.when(k < nb)
        def _():
            x = x_ref[...].astype(jnp.float32)
            rows = jax.lax.broadcasted_iota(jnp.int32, x.shape, 0) + b * tb
            d = jnp.where(rows < b_total, x - shift_ref[...], 0.0)  # mask ragged rows
            sum_ref[...] += jnp.sum(d, axis=0, keepdims=True)
            sumsq_ref[...] += jnp.sum(d * d, axis=0, keepdims=True)

        @pl.when(k == nb)
        def _():
            m = sum_ref[...] * inv_n                     # mean of (x - shift)
            var = jnp.maximum(sumsq_ref[...] * inv_n - m * m, 0.0)
            sum_ref[...] = shift_ref[...] + m            # true mean
            sumsq_ref[...] = jax.lax.rsqrt(var + EPS)    # 1 / sqrt(var + eps)

        @pl.when(k >= nb)
        def _():
            x = x_ref[...].astype(jnp.float32)
            p = jax.nn.sigmoid((x - sum_ref[...]) * sumsq_ref[...])
            alpha = alpha_ref[...]
            o_ref[...] = (x * (alpha + p * (1.0 - alpha))).astype(o_ref.dtype)

    return kernel


# ---------------------------------------------------------------------------
# Planning: generation-aware tile sizes + VMEM limit.
# ---------------------------------------------------------------------------
def _plan(B: int, D: int, itemsize: int):
    try:
        vmem_cap = int(pltpu.get_tpu_info().vmem_capacity_bytes)
    except Exception:
        vmem_cap = 64 * 1024 * 1024                      # conservative (v7x-sized)
    if vmem_cap >= 128 * 1024 * 1024:                    # v5e / v6e
        vmem_limit = 96 * 1024 * 1024
    else:                                                # v7x: 64 MiB per TC
        vmem_limit = min(48 * 1024 * 1024, (vmem_cap * 3) // 4)
    budget = (vmem_limit * 3) // 5                       # ~0.6 of the scoped limit

    d_rounded = pl.cdiv(D, LANE) * LANE
    # Bytes per feature column in the single-pass kernel:
    #   2x input dbuf + 2x output dbuf (x.dtype) + ~3 live f32 [B, td] temporaries.
    col_bytes = B * (4 * itemsize + 3 * 4)

    if D <= LANE:
        if col_bytes * D <= budget:
            return "single", D, vmem_limit               # block == full array dims
    else:
        max_td = budget // max(1, col_bytes)
        td = (max_td // LANE) * LANE
        if td >= LANE:
            td = min(td, d_rounded)
            n_tiles = pl.cdiv(d_rounded, td)
            # Near-equal lane-multiple tiles: bounds dead-lane waste to <128 cols.
            td = pl.cdiv(pl.cdiv(d_rounded, n_tiles), LANE) * LANE
            # Ensure >= 2 feature tiles when possible so both v7x TCs engage.
            if pl.cdiv(D, td) == 1 and d_rounded >= 2 * LANE:
                td = pl.cdiv(pl.cdiv(D, 2), LANE) * LANE
            return "single", td, vmem_limit

    # Large-batch fallback: a full-batch (B, 128) tile no longer fits VMEM.
    td = D if D <= LANE else min(512, d_rounded)
    elem_bytes = 4 * itemsize + 3 * 4
    max_tb = budget // max(1, td * elem_bytes)
    tb = max(8, (max_tb // 8) * 8)
    tb = min(tb, pl.cdiv(B, 8) * 8)
    return "two_pass", (tb, td), vmem_limit


# ---------------------------------------------------------------------------
# pallas_call wrappers
# ---------------------------------------------------------------------------
def _dice_single(x, alpha2d, td, vmem_limit):
    B, D = x.shape
    itemsize = jnp.dtype(x.dtype).itemsize
    nd = pl.cdiv(D, td)
    return pl.pallas_call(
        dice_kernel,
        out_shape=jax.ShapeDtypeStruct((B, D), x.dtype),
        grid_spec=pltpu.PrefetchScalarGridSpec(
            num_scalar_prefetch=0,
            grid=(nd,),
            in_specs=[
                pl.BlockSpec((B, td), lambda j: (0, j)),
                pl.BlockSpec((1, td), lambda j: (0, j)),
            ],
            out_specs=pl.BlockSpec((B, td), lambda j: (0, j)),
        ),
        compiler_params=pltpu.CompilerParams(
            dimension_semantics=("parallel",),           # shard D-tiles across TCs
            vmem_limit_bytes=vmem_limit,
        ),
        cost_estimate=pl.CostEstimate(
            flops=8 * B * D,
            transcendentals=B * D,
            bytes_accessed=2 * B * D * itemsize,
        ),
    )(x, alpha2d)


def _dice_two_pass(x, alpha2d, tb, td, vmem_limit):
    B, D = x.shape
    itemsize = jnp.dtype(x.dtype).itemsize
    nb = pl.cdiv(B, tb)
    nd = pl.cdiv(D, td)
    kernel = _make_two_pass_kernel(B, tb, nb)
    return pl.pallas_call(
        kernel,
        out_shape=jax.ShapeDtypeStruct((B, D), x.dtype),
        grid_spec=pltpu.PrefetchScalarGridSpec(
            num_scalar_prefetch=0,
            grid=(nd, 2 * nb),
            in_specs=[
                pl.BlockSpec((tb, td), lambda j, k: (k % nb, j)),
                pl.BlockSpec((1, td), lambda j, k: (0, j)),
            ],
            # Pass 0 parks the output window on block 0 (deferred writeback);
            # pass 1 walks the batch blocks and writes real data.
            out_specs=pl.BlockSpec((tb, td), lambda j, k: (jnp.maximum(k - nb, 0), j)),
            scratch_shapes=[pltpu.VMEM((1, td), jnp.float32)] * 3,
        ),
        compiler_params=pltpu.CompilerParams(
            dimension_semantics=("parallel", "arbitrary"),
            vmem_limit_bytes=vmem_limit,
        ),
        cost_estimate=pl.CostEstimate(
            flops=10 * B * D,
            transcendentals=B * D,
            bytes_accessed=3 * B * D * itemsize,
        ),
    )(x, alpha2d)


def dice(x: jax.Array, alpha: jax.Array) -> jax.Array:
    """x: [B, D], alpha: [D]  ->  [B, D] (Dice forward, BN training mode)."""
    B, D = x.shape
    itemsize = jnp.dtype(x.dtype).itemsize
    mode, tiles, vmem_limit = _plan(B, D, itemsize)
    alpha2d = alpha.reshape(1, D).astype(jnp.float32)    # keep the parameter in f32
    if mode == "single":
        return _dice_single(x, alpha2d, tiles, vmem_limit)
    tb, td = tiles
    return _dice_two_pass(x, alpha2d, tb, td, vmem_limit)


def dice_ref(x: jax.Array, alpha: jax.Array) -> jax.Array:
    """Pure-JAX reference matching PyTorch Dice.forward (BN in training mode)."""
    xf = x.astype(jnp.float32)
    mean = jnp.mean(xf, axis=0, keepdims=True)
    var = jnp.mean((xf - mean) ** 2, axis=0, keepdims=True)
    x_norm = (xf - mean) / jnp.sqrt(var + EPS)
    p = jax.nn.sigmoid(x_norm)
    a = alpha.astype(jnp.float32)[None, :]
    return (p * xf + (1.0 - p) * a * xf).astype(x.dtype)


if __name__ == "__main__":
    key = jax.random.PRNGKey(0)
    kx, ka = jax.random.split(key)

    # Small shapes consistent with the module: x is [batch, input_dim].
    B, D = 8, 32
    x = jax.random.normal(kx, (B, D), dtype=jnp.float32) * 2.0 + 3.0   # non-zero mean
    alpha = jax.random.normal(ka, (D,), dtype=jnp.float32) * 0.1

    out = jax.block_until_ready(dice(x, alpha))
    ref = dice_ref(x, alpha)
    assert out.shape == (B, D) and out.dtype == x.dtype
    assert jnp.allclose(out, ref, atol=1e-5, rtol=1e-5), "mismatch vs reference"

    # alpha = 0 (the module's init value)
    out0 = jax.block_until_ready(dice(x, jnp.zeros((D,), jnp.float32)))
    ref0 = dice_ref(x, jnp.zeros((D,), jnp.float32))
    assert jnp.allclose(out0, ref0, atol=1e-5, rtol=1e-5), "mismatch (alpha=0)"

    # Exercise the large-batch two-pass fallback on a small ragged shape
    # (ragged batch tile: 28 rows with tb=8; ragged feature tile: 160 cols with td=128).
    B2, D2 = 28, 160
    x2 = jax.random.normal(jax.random.PRNGKey(1), (B2, D2), dtype=jnp.float32) + 1.5
    a2 = jax.random.normal(jax.random.PRNGKey(2), (D2,), dtype=jnp.float32) * 0.1
    out2 = jax.block_until_ready(
        _dice_two_pass(x2, a2.reshape(1, D2).astype(jnp.float32),
                       tb=8, td=128, vmem_limit=48 * 1024 * 1024))
    ref2 = dice_ref(x2, a2)
    assert jnp.allclose(out2, ref2, atol=1e-5, rtol=1e-5), "mismatch (two-pass path)"

    print("KERNEL_OK")
</pallas_src>

<mosaic_0001>
module attributes {stable_mosaic.version = 11 : i64} {
  func.func @dice_kernel(%arg0: i32, %arg1: memref<8x32xf32, #tpu.memory_space<vmem>>, %arg2: memref<1x32xf32, #tpu.memory_space<vmem>>, %arg3: memref<8x32xf32, #tpu.memory_space<vmem>>) attributes {dimension_semantics = [#tpu.dimension_semantics<parallel>], iteration_bounds = array<i64: 1>, scalar_prefetch = 0 : i64, scratch_operands = 0 : i64, tpu.core_type = #tpu.core_type<tc>, window_params = [{transform_indices = @transform_0, window_bounds = array<i64: 8, 32>}, {transform_indices = @transform_1, window_bounds = array<i64: 1, 32>}, {transform_indices = @transform_2, window_bounds = array<i64: 8, 32>}]} {
    %c0 = arith.constant 0 : index
    %c0_0 = arith.constant 0 : index
    %0 = vector.load %arg1[%c0, %c0_0] : memref<8x32xf32, #tpu.memory_space<vmem>>, vector<8x32xf32>
    %cst = arith.constant dense<0.000000e+00> : vector<32xf32>
    %1 = vector.multi_reduction <add>, %0, %cst [0] : vector<8x32xf32> to vector<32xf32>
    %2 = vector.shape_cast %1 : vector<32xf32> to vector<1x32xf32>
    %cst_1 = arith.constant 1.250000e-01 : f32
    %3 = vector.broadcast %cst_1 : f32 to vector<1x32xf32>
    %4 = arith.mulf %2, %3 : vector<1x32xf32>
    %5 = vector.broadcast %4 : vector<1x32xf32> to vector<8x32xf32>
    %6 = arith.subf %0, %5 : vector<8x32xf32>
    %7 = arith.mulf %6, %6 : vector<8x32xf32>
    %cst_2 = arith.constant dense<0.000000e+00> : vector<32xf32>
    %8 = vector.multi_reduction <add>, %7, %cst_2 [0] : vector<8x32xf32> to vector<32xf32>
    %9 = vector.shape_cast %8 : vector<32xf32> to vector<1x32xf32>
    %cst_3 = arith.constant 1.250000e-01 : f32
    %10 = vector.broadcast %cst_3 : f32 to vector<1x32xf32>
    %11 = arith.mulf %9, %10 : vector<1x32xf32>
    %cst_4 = arith.constant 9.99999971E-10 : f32
    %12 = vector.broadcast %cst_4 : f32 to vector<1x32xf32>
    %13 = arith.addf %11, %12 : vector<1x32xf32>
    %14 = math.rsqrt %13 : vector<1x32xf32>
    %15 = vector.broadcast %14 : vector<1x32xf32> to vector<8x32xf32>
    %16 = arith.mulf %6, %15 : vector<8x32xf32>
    %17 = arith.negf %16 : vector<8x32xf32>
    %18 = math.exp %17 : vector<8x32xf32>
    %cst_5 = arith.constant 1.000000e+00 : f32
    %19 = vector.broadcast %cst_5 : f32 to vector<8x32xf32>
    %20 = arith.addf %19, %18 : vector<8x32xf32>
    %21 = arith.divf %19, %20 : vector<8x32xf32>
    %c0_6 = arith.constant 0 : index
    %c0_7 = arith.constant 0 : index
    %22 = vector.load %arg2[%c0_6, %c0_7] : memref<1x32xf32, #tpu.memory_space<vmem>>, vector<1x32xf32>
    %cst_8 = arith.constant 1.000000e+00 : f32
    %23 = vector.broadcast %cst_8 : f32 to vector<1x32xf32>
    %24 = arith.subf %23, %22 : vector<1x32xf32>
    %25 = vector.broadcast %24 : vector<1x32xf32> to vector<8x32xf32>
    %26 = arith.mulf %21, %25 : vector<8x32xf32>
    %27 = vector.broadcast %22 : vector<1x32xf32> to vector<8x32xf32>
    %28 = arith.addf %27, %26 : vector<8x32xf32>
    %29 = arith.mulf %0, %28 : vector<8x32xf32>
    %c0_9 = arith.constant 0 : index
    %c0_10 = arith.constant 0 : index
    %30 = vector.load %arg3[%c0_9, %c0_10] : memref<8x32xf32, #tpu.memory_space<vmem>>, vector<8x32xf32>
    tpu.vector_store %arg3[%c0_9, %c0_10], %29 {strides = array<i32>} : memref<8x32xf32, #tpu.memory_space<vmem>>, vector<8x32xf32>,
    return
  }
  func.func @transform_0(%arg0: i32) -> (i32, i32) {
    %c0_i32 = arith.constant 0 : i32
    %c0_i32_0 = arith.constant 0 : i32
    return %c0_i32, %arg0 : i32, i32
  }
  func.func @transform_1(%arg0: i32) -> (i32, i32) {
    %c0_i32 = arith.constant 0 : i32
    %c0_i32_0 = arith.constant 0 : i32
    return %c0_i32, %arg0 : i32, i32
  }
  func.func @transform_2(%arg0: i32) -> (i32, i32) {
    %c0_i32 = arith.constant 0 : i32
    %c0_i32_0 = arith.constant 0 : i32
    return %c0_i32, %arg0 : i32, i32
  }
}

</mosaic_0001>

<bundles_post_ra>
// kernel: tpu_custom_call.1
= control target key start
LH: loop header
LB: loop body
LE: loop exit
PB: predicated region body
PF: predicated region fallthrough
CT: control target
= control target key end

     0   :  { %7 = vsyncpa [#allocation3], 0  ;;  %s168_s0 = inlined_call_operand.hbm [shape: f32[8,32], index: 0, kind: input, shape index: {}]   ;;  %s169_s1 = inlined_call_operand.vmem [shape: f32[1,32], index: 1, kind: input, shape index: {}]   ;;  %s170_s2 = inlined_call_operand.hbm [shape: f32[8,32], index: 2, kind: output, shape index: {}]  }
   0x1   :  { %8 = vsyncpa [#allocation4], 0  ;;  %s139_s9 = smov [#allocation2]  }
   0x2   :  { %s15_s10 = sshll.u32 %s139_s9, 4  ;;  %s16_s10 = int_to_ptr.vmem [resolvable:$true] %s15_s10 }
   0x3   :  { %s103_s11 = scalar_lea.vmem %s16_s10, 128  ;;  %p108_p1 = scmp.lt.s32.totalorder %s16_s10, %s16_s10 }
   0x4   :  { %p104_p0 = scmp.ne.s32.totalorder %s16_s10, %s103_s11  ;;  %p109_p2 = scmp.lt.s32.totalorder %s103_s11, %s103_s11 }
   0x6   :  { %p110_p3 = por %p109_p2, %p108_p1 }
   0x8   :  { %p111_p4 = pnand %p110_p3, %p104_p0 }
   0xa   :  { %114 = shalt.err (!%p111_p4)
}
   0xb   :  { %18 = dma.hbm_to_vmem [thread:$0]  %s168_s0, 128, %s16_s10, [#allocation3]  }
   0xc   :  { %135 = dma.done.wait [#allocation3], 128  }
   0xd   :  { %136 = vsyncadd [#allocation3], 4294967168  ;;  %vm25_vm0 = vcmask 261120   ;;  %v24_v0 = vld [vmem:[#allocation2] sm:$0xff]  ;;  %v56_v25 = vlaneseq  ;;  %s140_s15 = smov [#allocation5]  }
   0xe   :  { %v26_v1 = vsel %vm25_vm0, %v24_v0, 0.0  ;;  %v53_v27 = vld [vmem:[%s169_s1] sm:$0x1]  ;;  %s77_s16 = sshll.u32 %s140_s15, 4  ;;  %s78_s16 = int_to_ptr.vmem [resolvable:$true] %s77_s16 }
   0xf   :  { %v27_v2 = vrot.slane %v26_v1, 4  ;;  %v57_v26 = vshrl.u32 %v56_v25, 7  ;;  %v54_v28 = vsub.f32 1.0, %v53_v27  ;;  %s115_s17 = scalar_lea.vmem %s78_s16, 128  ;;  %p120_p6 = scmp.lt.s32.totalorder %s78_s16, %s78_s16 }
  0x10   :  { %p116_p5 = scmp.ne.s32.totalorder %s78_s16, %s115_s17  ;;  %p121_p7 = scmp.lt.s32.totalorder %s115_s17, %s115_s17 }
  0x11   :  { %v28_v3 = vadd.f32 %v27_v2, %v26_v1  ;;  %v58_v29 = vsub.s32 0, %v57_v26 }
  0x12   :  { %p122_p8 = por %p121_p7, %p120_p6 }
  0x13   :  { %v29_v4 = vrot.slane %v28_v3, 2  ;;  %v59_v30 = vrot.slane %v54_v28, %v58_v29  ;;  %v66_v31 = vrot.slane %v53_v27, %v58_v29 }
  0x14   :  { %p123_p9 = pnand %p122_p8, %p116_p5 }
  0x15   :  { %v30_v5 = vadd.f32 %v29_v4, %v28_v3 }
  0x17   :  { %v31_v6 = vrot.slane %v30_v5, 1 }
  0x19   :  { %v32_v7 = vadd.f32 %v31_v6, %v30_v5 }
  0x1b   :  { %v33_v8 = vmul.f32 0.125, %v32_v7 }
  0x1d   :  { %v34_v9 = vsub.f32 %v24_v0, %v33_v8 }
  0x1f   :  { %v35_v10 = vmul.f32 %v34_v9, %v34_v9 }
  0x21   :  { %v36_v11 = vsel %vm25_vm0, %v35_v10, 0.0 }
  0x22   :  { %v37_v12 = vrot.slane %v36_v11, 4 }
  0x24   :  { %v38_v13 = vadd.f32 %v37_v12, %v36_v11 }
  0x26   :  { %v39_v14 = vrot.slane %v38_v13, 2 }
  0x28   :  { %v40_v15 = vadd.f32 %v39_v14, %v38_v13 }
  0x2a   :  { %v41_v16 = vrot.slane %v40_v15, 1 }
  0x2c   :  { %v42_v17 = vadd.f32 %v41_v16, %v40_v15 }
  0x2e   :  { %v43_v18 = vmul.f32 0.125, %v42_v17 }
  0x30   :  { %v44_v19 = vadd.f32 1e-09, %v43_v18 }
  0x32   :  { %89 = vrsqrt.f32 %v44_v19 }
  0x3f   :  { %v90_v20 = vpop.eup %89 }
  0x40   :  { %v46_v21 = vmul.f32 %v90_v20, %v34_v9 }
  0x42   :  { %v86_v22 = vmul.f32 -1.442695, %v46_v21 }
  0x44   :  { %91 = vpow2.f32 %v86_v22 }
  0x51   :  { %v92_v23 = vpop.eup %91 }
  0x52   :  { %v50_v24 = vadd.f32 1.0, %v92_v23 }
  0x54   :  { %93 = vrcp.f32 %v50_v24 }
  0x61   :  { %v94_v32 = vpop.eup %93 }
  0x62   :  { %v61_v33 = vmul.f32 %v94_v32, %v59_v30 }
  0x64   :  { %v68_v34 = vadd.f32 %v66_v31, %v61_v33 }
  0x66   :  { %v69_v35 = vmul.f32 %v68_v34, %v24_v0 }
  0x68   :  { %70 = vst.msk [vmem:[#allocation5] sm:$0xff] %vm25_vm0, %v69_v35 }
  0x69   :  { %126 = shalt.err (!%p123_p9)
}
  0x6a   :  { %80 = dma.vmem_to_hbm [thread:$0]  %s78_s16, 128, %s170_s2, [#allocation4]  }
  0x6b   :  { %137 = dma.done.wait [#allocation4], 128  }
  0x6c   :  { %138 = vsyncadd [#allocation4], 4294967168 }
  0x6d   :  { %84 = vsyncpa [#allocation3], 1 }
  0x6e   :  { %85 = vsyncpa [#allocation4], 1 }

</bundles_post_ra>
